<compile_context>
chip_gen: v7x
topology: tpu7x:2x2x1
jax: 0.10.0
libtpu: 0.0.40
codegen_flags: <defaults>
</compile_context>

<pallas_src>
import functools

import jax
import jax.numpy as jnp
from jax.experimental import pallas as pl
from jax.experimental.pallas import tpu as pltpu


def _round_up(x, m):
    return (x + m - 1) // m * m


# ----------------------------------------------------------------------------
# Pallas kernel: one (M_tile x K) x (K x Cout_tile) matmul + bias + LeakyReLU
#   x_ref : [m_tile, K]      bf16  (im2col slab block, streamed over M)
#   w_ref : [K, c_tile]      bf16  (BN scale pre-folded, resident over M)
#   b_ref : [1, c_tile]      f32   (folded BN shift, or conv bias)
#   o_ref : [m_tile, c_tile]
# ----------------------------------------------------------------------------
def _matmul_bias_act_kernel(x_ref, w_ref, b_ref, o_ref, *, leaky):
    acc = jnp.dot(x_ref[...], w_ref[...], preferred_element_type=jnp.float32)
    y = acc + b_ref[...]
    if leaky:
        y = jnp.where(y > 0, y, 0.1 * y)  # LeakyReLU(0.1)
    o_ref[...] = y.astype(o_ref.dtype)


def _matmul_bias_act(x2d, w2d, bias, leaky, out_dtype, m_tile, c_tile):
    M, K = x2d.shape
    _, Cout = w2d.shape
    grid = (Cout // c_tile, M // m_tile)  # outer: Cout tiles, inner: M tiles
    return pl.pallas_call(
        functools.partial(_matmul_bias_act_kernel, leaky=leaky),
        out_shape=jax.ShapeDtypeStruct((M, Cout), out_dtype),
        grid=grid,
        in_specs=[
            pl.BlockSpec((m_tile, K), lambda j, i: (i, 0)),   # streamed
            pl.BlockSpec((K, c_tile), lambda j, i: (0, j)),   # resident in M
            pl.BlockSpec((1, c_tile), lambda j, i: (0, j)),   # resident in M
        ],
        out_specs=pl.BlockSpec((m_tile, c_tile), lambda j, i: (i, j)),
        compiler_params=pltpu.CompilerParams(
            dimension_semantics=("parallel", "parallel")),
    )(x2d, w2d, bias)


# ----------------------------------------------------------------------------
# Conv (stride-1 'same', k=1 or 3) + folded-BN affine + optional LeakyReLU
# ----------------------------------------------------------------------------
def conv2d_affine_act(x_nhwc, w_hwio, scale, shift, leaky,
                      out_dtype=jnp.bfloat16):
    """x_nhwc: [N,H,W,Cin]; w_hwio: [kh,kw,Cin,Cout]; scale/shift: [Cout]."""
    N, H, W, Cin = x_nhwc.shape
    kh, kw, _, Cout = w_hwio.shape

    # Fold the per-output-channel BN scale into the weights (commutes with
    # the contraction) -> kernel only adds the shift.
    w = w_hwio.astype(jnp.float32) * scale.astype(jnp.float32)[None, None, None, :]
    w2d = w.reshape(kh * kw * Cin, Cout).astype(jnp.bfloat16)

    # im2col as ONE [M, kh*kw*Cin] slab (channel concat) -> single deep-K dot.
    if kh == 1 and kw == 1:
        cols = x_nhwc.reshape(N * H * W, Cin)
    else:
        ph, pw = (kh - 1) // 2, (kw - 1) // 2
        xp = jnp.pad(x_nhwc, ((0, 0), (ph, ph), (pw, pw), (0, 0)))
        taps = [xp[:, dy:dy + H, dx:dx + W, :]
                for dy in range(kh) for dx in range(kw)]
        cols = jnp.concatenate(taps, axis=-1).reshape(N * H * W, kh * kw * Cin)
    cols = cols.astype(jnp.bfloat16)

    M, K = cols.shape
    # Lane/tile-friendly zero padding (does not change the conv result).
    K_pad = _round_up(K, 128)
    Cout_pad = _round_up(Cout, 128)
    c_tile = 256 if Cout_pad % 256 == 0 else 128
    m_tile = 512 if M >= 512 else _round_up(M, 8)
    M_pad = _round_up(M, m_tile)

    cols_p = jnp.pad(cols, ((0, M_pad - M), (0, K_pad - K)))
    w2d_p = jnp.pad(w2d, ((0, K_pad - K), (0, Cout_pad - Cout)))
    shift_p = jnp.pad(shift.astype(jnp.float32),
                      (0, Cout_pad - Cout)).reshape(1, Cout_pad)

    out = _matmul_bias_act(cols_p, w2d_p, shift_p, leaky, out_dtype,
                           m_tile, c_tile)
    return out[:M, :Cout].reshape(N, H, W, Cout)


# ----------------------------------------------------------------------------
# Parameter construction (deterministic, synthetic; eval-mode BN folding)
# ----------------------------------------------------------------------------
def make_convbn_params(key, cin, cout, k):
    kw_, kg, kb, km, kv = jax.random.split(key, 5)
    w = 0.1 * jax.random.normal(kw_, (k, k, cin, cout), jnp.float32)
    gamma = jax.random.uniform(kg, (cout,), jnp.float32, 0.5, 1.5)
    beta = 0.1 * jax.random.normal(kb, (cout,), jnp.float32)
    mean = 0.1 * jax.random.normal(km, (cout,), jnp.float32)
    var = jax.random.uniform(kv, (cout,), jnp.float32, 0.5, 1.5)
    eps = 1e-5
    scale = gamma / jnp.sqrt(var + eps)          # folded BN (eval-mode)
    shift = beta - mean * scale
    return {"w": w, "scale": scale, "shift": shift}


def make_conv_bias_params(key, cin, cout, k):
    kw_, kb = jax.random.split(key, 2)
    w = 0.1 * jax.random.normal(kw_, (k, k, cin, cout), jnp.float32)
    b = 0.1 * jax.random.normal(kb, (cout,), jnp.float32)
    return {"w": w, "scale": jnp.ones((cout,), jnp.float32), "shift": b}


def init_yolov3_upsample_prep(key, filters_list, in_filters, out_filters):
    f0, f1 = filters_list
    specs_branch = [(in_filters, f0, 1), (f0, f1, 3), (f1, f0, 1),
                    (f0, f1, 3), (f1, f0, 1)]
    keys = jax.random.split(key, 7)
    branch = [make_convbn_params(keys[i], ci, co, k)
              for i, (ci, co, k) in enumerate(specs_branch)]
    for_yolo = [
        make_convbn_params(keys[5], f0, f1, 3),
        make_conv_bias_params(keys[6], f1, out_filters, 1),
    ]
    return {"branch": branch, "for_yolo": for_yolo}


# ----------------------------------------------------------------------------
# Forward (matches PyTorch module: returns (branch_out, yolo_out), NCHW)
# ----------------------------------------------------------------------------
def yolov3_upsample_prep_forward(params, x_nchw):
    x = jnp.transpose(x_nchw, (0, 2, 3, 1)).astype(jnp.bfloat16)  # NCHW->NHWC
    for p in params["branch"]:
        x = conv2d_affine_act(x, p["w"], p["scale"], p["shift"], leaky=True)
    branch_out = x
    # for_yolo[0]: ConvBN 3x3 (leaky); for_yolo[1]: plain Conv2d 1x1 + bias
    p = params["for_yolo"][0]
    x = conv2d_affine_act(x, p["w"], p["scale"], p["shift"], leaky=True)
    p = params["for_yolo"][1]
    x = conv2d_affine_act(x, p["w"], p["scale"], p["shift"], leaky=False)
    # NHWC -> NCHW (f32) to match PyTorch output convention
    return (jnp.transpose(branch_out, (0, 3, 1, 2)).astype(jnp.float32),
            jnp.transpose(x, (0, 3, 1, 2)).astype(jnp.float32))


if __name__ == "__main__":
    key = jax.random.PRNGKey(0)
    k_param, k_x = jax.random.split(key)

    # Small synthetic shapes consistent with the module.
    filters_list = [8, 16]
    in_filters = 12
    out_filters = 18          # e.g. 3 anchors * (5 + 1 class)
    N, H, W = 2, 8, 8

    params = init_yolov3_upsample_prep(k_param, filters_list, in_filters,
                                       out_filters)
    x = jax.random.normal(k_x, (N, in_filters, H, W), jnp.float32)  # NCHW

    fwd = jax.jit(yolov3_upsample_prep_forward)
    branch_out, yolo_out = fwd(params, x)
    jax.block_until_ready((branch_out, yolo_out))

    assert branch_out.shape == (N, filters_list[0], H, W), branch_out.shape
    assert yolo_out.shape == (N, out_filters, H, W), yolo_out.shape
    print("KERNEL_OK")
</pallas_src>

<mosaic_0001>
module attributes {stable_mosaic.version = 11 : i64} {
  func.func @_matmul_bias_act_kernel(%arg0: i32, %arg1: i32, %arg2: memref<128x128xbf16, #tpu.memory_space<vmem>>, %arg3: memref<128x128xbf16, #tpu.memory_space<vmem>>, %arg4: memref<1x128xf32, #tpu.memory_space<vmem>>, %arg5: memref<128x128xbf16, #tpu.memory_space<vmem>>) attributes {dimension_semantics = [#tpu.dimension_semantics<parallel>, #tpu.dimension_semantics<parallel>], iteration_bounds = array<i64: 1, 1>, scalar_prefetch = 0 : i64, scratch_operands = 0 : i64, tpu.core_type = #tpu.core_type<tc>, window_params = [{transform_indices = @transform_0, window_bounds = array<i64: 128, 128>}, {transform_indices = @transform_1, window_bounds = array<i64: 128, 128>}, {transform_indices = @transform_2, window_bounds = array<i64: 1, 128>}, {transform_indices = @transform_3, window_bounds = array<i64: 128, 128>}]} {
    %c0 = arith.constant 0 : index
    %c0_0 = arith.constant 0 : index
    %0 = vector.load %arg2[%c0, %c0_0] : memref<128x128xbf16, #tpu.memory_space<vmem>>, vector<128x128xbf16>
    %c0_1 = arith.constant 0 : index
    %c0_2 = arith.constant 0 : index
    %1 = vector.load %arg3[%c0_1, %c0_2] : memref<128x128xbf16, #tpu.memory_space<vmem>>, vector<128x128xbf16>
    %cst = arith.constant dense<0.000000e+00> : vector<128x128xf32>
    %2 = tpu.matmul %0, %1, %cst {dimension_numbers = #tpu.dot_dimension_numbers<[1], [0], [0], [1], [0, 0, 1, 1], [], []>} : vector<128x128xbf16>, vector<128x128xbf16>, vector<128x128xf32> -> vector<128x128xf32>
    %c0_3 = arith.constant 0 : index
    %c0_4 = arith.constant 0 : index
    %3 = vector.load %arg4[%c0_3, %c0_4] : memref<1x128xf32, #tpu.memory_space<vmem>>, vector<1x128xf32>
    %4 = vector.broadcast %3 : vector<1x128xf32> to vector<128x128xf32>
    %5 = arith.addf %2, %4 : vector<128x128xf32>
    %cst_5 = arith.constant 0.000000e+00 : f32
    %6 = vector.broadcast %cst_5 : f32 to vector<128x128xf32>
    %7 = arith.cmpf ogt, %5, %6 : vector<128x128xf32>
    %cst_6 = arith.constant 1.000000e-01 : f32
    %8 = vector.broadcast %cst_6 : f32 to vector<128x128xf32>
    %9 = arith.mulf %8, %5 : vector<128x128xf32>
    %10 = arith.select %7, %5, %9 : vector<128x128xi1>, vector<128x128xf32>
    %11 = arith.truncf %10 : vector<128x128xf32> to vector<128x128xbf16>
    %c0_7 = arith.constant 0 : index
    %c0_8 = arith.constant 0 : index
    %12 = vector.load %arg5[%c0_7, %c0_8] : memref<128x128xbf16, #tpu.memory_space<vmem>>, vector<128x128xbf16>
    tpu.vector_store %arg5[%c0_7, %c0_8], %11 {strides = array<i32>} : memref<128x128xbf16, #tpu.memory_space<vmem>>, vector<128x128xbf16>,
    return
  }
  func.func @transform_0(%arg0: i32, %arg1: i32) -> (i32, i32) {
    %c0_i32 = arith.constant 0 : i32
    %c0_i32_0 = arith.constant 0 : i32
    return %arg1, %c0_i32 : i32, i32
  }
  func.func @transform_1(%arg0: i32, %arg1: i32) -> (i32, i32) {
    %c0_i32 = arith.constant 0 : i32
    %c0_i32_0 = arith.constant 0 : i32
    return %c0_i32, %arg0 : i32, i32
  }
  func.func @transform_2(%arg0: i32, %arg1: i32) -> (i32, i32) {
    %c0_i32 = arith.constant 0 : i32
    %c0_i32_0 = arith.constant 0 : i32
    return %c0_i32, %arg0 : i32, i32
  }
  func.func @transform_3(%arg0: i32, %arg1: i32) -> (i32, i32) {
    %c0_i32 = arith.constant 0 : i32
    return %arg1, %arg0 : i32, i32
  }
}

module attributes {stable_mosaic.version = 11 : i64} {
  func.func @_matmul_bias_act_kernel(%arg0: i32, %arg1: i32, %arg2: memref<128x128xbf16, #tpu.memory_space<vmem>>, %arg3: memref<128x128xbf16, #tpu.memory_space<vmem>>, %arg4: memref<1x128xf32, #tpu.memory_space<vmem>>, %arg5: memref<128x128xbf16, #tpu.memory_space<vmem>>) attributes {dimension_semantics = [#tpu.dimension_semantics<parallel>, #tpu.dimension_semantics<parallel>], iteration_bounds = array<i64: 1, 1>, scalar_prefetch = 0 : i64, scratch_operands = 0 : i64, tpu.core_type = #tpu.core_type<tc>, window_params = [{transform_indices = @transform_0, window_bounds = array<i64: 128, 128>}, {transform_indices = @transform_1, window_bounds = array<i64: 128, 128>}, {transform_indices = @transform_2, window_bounds = array<i64: 1, 128>}, {transform_indices = @transform_3, window_bounds = array<i64: 128, 128>}]} {
    %c0 = arith.constant 0 : index
    %c0_0 = arith.constant 0 : index
    %0 = vector.load %arg2[%c0, %c0_0] : memref<128x128xbf16, #tpu.memory_space<vmem>>, vector<128x128xbf16>
    %c0_1 = arith.constant 0 : index
    %c0_2 = arith.constant 0 : index
    %1 = vector.load %arg3[%c0_1, %c0_2] : memref<128x128xbf16, #tpu.memory_space<vmem>>, vector<128x128xbf16>
    %cst = arith.constant dense<0.000000e+00> : vector<128x128xf32>
    %2 = tpu.matmul %0, %1, %cst {dimension_numbers = #tpu.dot_dimension_numbers<[1], [0], [0], [1], [0, 0, 1, 1], [], []>} : vector<128x128xbf16>, vector<128x128xbf16>, vector<128x128xf32> -> vector<128x128xf32>
    %c0_3 = arith.constant 0 : index
    %c0_4 = arith.constant 0 : index
    %3 = vector.load %arg4[%c0_3, %c0_4] : memref<1x128xf32, #tpu.memory_space<vmem>>, vector<1x128xf32>
    %4 = vector.broadcast %3 : vector<1x128xf32> to vector<128x128xf32>
    %5 = arith.addf %2, %4 : vector<128x128xf32>
    %6 = arith.truncf %5 : vector<128x128xf32> to vector<128x128xbf16>
    %c0_5 = arith.constant 0 : index
    %c0_6 = arith.constant 0 : index
    %7 = vector.load %arg5[%c0_5, %c0_6] : memref<128x128xbf16, #tpu.memory_space<vmem>>, vector<128x128xbf16>
    tpu.vector_store %arg5[%c0_5, %c0_6], %6 {strides = array<i32>} : memref<128x128xbf16, #tpu.memory_space<vmem>>, vector<128x128xbf16>,
    return
  }
  func.func @transform_0(%arg0: i32, %arg1: i32) -> (i32, i32) {
    %c0_i32 = arith.constant 0 : i32
    %c0_i32_0 = arith.constant 0 : i32
    return %arg1, %c0_i32 : i32, i32
  }
  func.func @transform_1(%arg0: i32, %arg1: i32) -> (i32, i32) {
    %c0_i32 = arith.constant 0 : i32
    %c0_i32_0 = arith.constant 0 : i32
    return %c0_i32, %arg0 : i32, i32
  }
  func.func @transform_2(%arg0: i32, %arg1: i32) -> (i32, i32) {
    %c0_i32 = arith.constant 0 : i32
    %c0_i32_0 = arith.constant 0 : i32
    return %c0_i32, %arg0 : i32, i32
  }
  func.func @transform_3(%arg0: i32, %arg1: i32) -> (i32, i32) {
    %c0_i32 = arith.constant 0 : i32
    return %arg1, %arg0 : i32, i32
  }
}

</mosaic_0001>

<bundles_post_ra>
// kernel: yolov3_upsample_prep_forward.7
= control target key start
LH: loop header
LB: loop body
LE: loop exit
PB: predicated region body
PF: predicated region fallthrough
CT: control target
= control target key end

     0   :  { %s672_s1 = inlined_call_operand.vmem [shape: bf16[128,128], index: 1, kind: input, shape index: {}]   ;;  %s673_s0 = inlined_call_operand.vmem [shape: bf16[128,128], index: 0, kind: input, shape index: {}]   ;;  %s674_s2 = inlined_call_operand.vmem [shape: f32[1,128], index: 2, kind: input, shape index: {}]   ;;  %s675_s3 = inlined_call_operand.vmem [shape: bf16[128,128], index: 3, kind: output, shape index: {}]  }
   0x1   :  { %v539_v0 = vld [vmem:[%s672_s1] sm:$0xff]   ;;  %v540_v1 = vld [vmem:[%s672_s1 + $0x8] sm:$0xff]   ;;  %v541_v2 = vld [vmem:[%s672_s1 + $0x10] sm:$0xff]  }
   0x2   :  { %491 = vmatprep.subr.bf16.mxu0 %v539_v0  ;;  %523 = vmatprep.subr.bf16.mxu1 %v539_v0  ;;  %v542_v3 = vld [vmem:[%s672_s1 + $0x18] sm:$0xff]   ;;  %v547_v4 = vld [vmem:[%s673_s0] sm:$0xff]   ;;  %v544_v7 = vld [vmem:[%s672_s1 + $0x28] sm:$0xff]  }
   0x3   :  { %492 = vmatpush3.bf16.msra.mxu0 %v539_v0  ;;  %531 = vmatpush3.bf16.msra.mxu1 %v539_v0  ;;  %v548_v5 = vld [vmem:[%s673_s0 + $0x20] sm:$0xff]   ;;  %v545_v8 = vld [vmem:[%s672_s1 + $0x30] sm:$0xff]   ;;  %v546_v9 = vld [vmem:[%s672_s1 + $0x38] sm:$0xff]  }
   0x4   :  { %493 = vmatprep.subr.bf16.mxu0 %v540_v1  ;;  %524 = vmatprep.subr.bf16.mxu1 %v540_v1  ;;  %v543_v6 = vld [vmem:[%s672_s1 + $0x20] sm:$0xff]   ;;  %v549_v10 = vld [vmem:[%s673_s0 + $0x8] sm:$0xff]   ;;  %v551_v12 = vld [vmem:[%s673_s0 + $0x10] sm:$0xff]  }
   0x5   :  { %507 = vmatprep.mubr.bf16.mxu0 %v547_v4  ;;  %515 = vmatprep.mubr.bf16.mxu1 %v548_v5  ;;  %v550_v11 = vld [vmem:[%s673_s0 + $0x28] sm:$0xff]   ;;  %v552_v13 = vld [vmem:[%s673_s0 + $0x30] sm:$0xff]   ;;  %v553_v14 = vld [vmem:[%s673_s0 + $0x18] sm:$0xff]  }
   0x6   :  { %v554_v15 = vld [vmem:[%s673_s0 + $0x38] sm:$0xff]   ;;  %v626_v16 = vld [vmem:[%s674_s2] ss:$0 sm:$0xff] }
   0x7   :  { %494 = vmatpush3.bf16.msra.mxu0 %v540_v1  ;;  %532 = vmatpush3.bf16.msra.mxu1 %v540_v1 }
   0x8   :  { %495 = vmatprep.subr.bf16.mxu0 %v541_v2  ;;  %525 = vmatprep.subr.bf16.mxu1 %v541_v2 }
   0xb   :  { %496 = vmatpush3.bf16.msra.mxu0 %v541_v2  ;;  %533 = vmatpush3.bf16.msra.mxu1 %v541_v2 }
   0xc   :  { %497 = vmatprep.subr.bf16.mxu0 %v542_v3  ;;  %526 = vmatprep.subr.bf16.mxu1 %v542_v3 }
   0xf   :  { %498 = vmatpush3.bf16.msra.mxu0 %v542_v3  ;;  %534 = vmatpush3.bf16.msra.mxu1 %v542_v3 }
  0x10   :  { %499 = vmatprep.subr.bf16.mxu0 %v543_v6  ;;  %527 = vmatprep.subr.bf16.mxu1 %v543_v6 }
  0x13   :  { %500 = vmatpush3.bf16.msra.mxu0 %v543_v6  ;;  %535 = vmatpush3.bf16.msra.mxu1 %v543_v6 }
  0x14   :  { %501 = vmatprep.subr.bf16.mxu0 %v544_v7  ;;  %528 = vmatprep.subr.bf16.mxu1 %v544_v7 }
  0x17   :  { %502 = vmatpush3.bf16.msra.mxu0 %v544_v7  ;;  %536 = vmatpush3.bf16.msra.mxu1 %v544_v7 }
  0x18   :  { %503 = vmatprep.subr.bf16.mxu0 %v545_v8  ;;  %529 = vmatprep.subr.bf16.mxu1 %v545_v8 }
  0x1b   :  { %504 = vmatpush3.bf16.msra.mxu0 %v545_v8  ;;  %537 = vmatpush3.bf16.msra.mxu1 %v545_v8 }
  0x1c   :  { %505 = vmatprep.subr.bf16.mxu0 %v546_v9  ;;  %530 = vmatprep.subr.bf16.mxu1 %v546_v9 }
  0x1f   :  { %506 = vmatpush3.bf16.msra.mxu0 %v546_v9  ;;  %538 = vmatpush3.bf16.msra.mxu1 %v546_v9 }
  0x22   :  { %508 = vmatmul.mubr.bf16.vlgmr.msra.gmra.mrb[0].mxu0 %v549_v10  ;;  %516 = vmatmul.mubr.bf16.vlgmr.msra.gmra.mrb[0].mxu1 %v550_v11 }
  0x23   :  { %511 = vmatprep.mubr.bf16.mxu0 %v551_v12  ;;  %519 = vmatprep.mubr.bf16.mxu1 %v552_v13 }
  0x2a   :  { %512 = vmatmul.mubr.bf16.gmra.mrb[4].mxu0 %v553_v14  ;;  %520 = vmatmul.mubr.bf16.gmra.mrb[4].mxu1 %v554_v15 }
  0xf5   :  { %v509_v17 = vpop.f32.mrb[0].mxu0  ;;  %v517_v18 = vpop.f32.mrb[0].mxu1 }
  0xf6   :  { %v193_v19 = vadd.f32 %v509_v17, %v626_v16  ;;  %v225_v20 = vadd.f32 %v517_v18, %v626_v16  ;;  %v184_v21 = vpop.f32.mrb[1].mxu0  ;;  %v216_v22 = vpop.f32.mrb[1].mxu1 }
  0xf7   :  { %v185_v23 = vadd.f32 %v626_v16, %v184_v21  ;;  %v217_v24 = vadd.f32 %v626_v16, %v216_v22  ;;  %v510_v25 = vpop.f32.mrb[2].mxu0  ;;  %v518_v26 = vpop.f32.mrb[2].mxu1 }
  0xf8   :  { %vm249_vm0 = vcmp.gt.f32.partialorder %v193_v19, 0.0  ;;  %v265_v27 = vmul.f32 0.1, %v193_v19  ;;  %vm257_vm1 = vcmp.gt.f32.partialorder %v225_v20, 0.0  ;;  %v273_v28 = vmul.f32 0.1, %v225_v20 }
  0xf9   :  { %vm247_vm2 = vcmp.gt.f32.partialorder %v185_v23, 0.0  ;;  %v263_v29 = vmul.f32 0.1, %v185_v23  ;;  %vm255_vm3 = vcmp.gt.f32.partialorder %v217_v24, 0.0  ;;  %v271_v30 = vmul.f32 0.1, %v217_v24 }
  0xfa   :  { %v196_v31 = vadd.f32 %v510_v25, %v626_v16  ;;  %v228_v32 = vadd.f32 %v518_v26, %v626_v16  ;;  %v187_v33 = vpop.f32.mrb[3].mxu0  ;;  %v219_v34 = vpop.f32.mrb[3].mxu1  ;;  %v281_v35 = vsel %vm249_vm0, %v193_v19, %v265_v27  ;;  %v289_v36 = vsel %vm257_vm1, %v225_v20, %v273_v28 }
  0xfb   :  { %v188_v37 = vadd.f32 %v626_v16, %v187_v33  ;;  %v220_v38 = vadd.f32 %v626_v16, %v219_v34  ;;  %v279_v43 = vsel %vm247_vm2, %v185_v23, %v263_v29  ;;  %v287_v44 = vsel %vm255_vm3, %v217_v24, %v271_v30 }
  0xfc   :  { %vm250_vm4 = vcmp.gt.f32.partialorder %v196_v31, 0.0  ;;  %v266_v39 = vmul.f32 0.1, %v196_v31  ;;  %vm258_vm5 = vcmp.gt.f32.partialorder %v228_v32, 0.0  ;;  %v274_v40 = vmul.f32 0.1, %v228_v32 }
  0xfd   :  { %vm248_vm6 = vcmp.gt.f32.partialorder %v188_v37, 0.0  ;;  %v264_v41 = vmul.f32 0.1, %v188_v37  ;;  %vm256_vm7 = vcmp.gt.f32.partialorder %v220_v38, 0.0  ;;  %v272_v42 = vmul.f32 0.1, %v220_v38 }
  0xfe   :  { %v282_v45 = vsel %vm250_vm4, %v196_v31, %v266_v39  ;;  %v290_v46 = vsel %vm258_vm5, %v228_v32, %v274_v40  ;;  %v513_v47 = vpop.f32.mrb[4].mxu0  ;;  %v521_v48 = vpop.f32.mrb[4].mxu1 }
  0xff   :  { %v436_v49 = vpack.c.bf16 %v282_v45, %v281_v35  ;;  %v456_v50 = vpack.c.bf16 %v290_v46, %v289_v36  ;;  %v280_v51 = vsel %vm248_vm6, %v188_v37, %v264_v41  ;;  %v288_v52 = vsel %vm256_vm7, %v220_v38, %v272_v42  ;;  %v200_v53 = vpop.f32.mrb[5].mxu0  ;;  %v232_v54 = vpop.f32.mrb[5].mxu1 }
 0x100   :  { %v431_v55 = vpack.c.bf16 %v280_v51, %v279_v43  ;;  %v451_v56 = vpack.c.bf16 %v288_v52, %v287_v44  ;;  %v209_v57 = vadd.f32 %v513_v47, %v626_v16  ;;  %v241_v58 = vadd.f32 %v521_v48, %v626_v16  ;;  %v514_v59 = vpop.f32.mrb[6].mxu0  ;;  %v522_v60 = vpop.f32.mrb[6].mxu1 }
 0x101   :  { %468 = vst [vmem:[%s675_s3 + $0x8] sm:$0xff] %v436_v49   ;;  %472 = vst [vmem:[%s675_s3 + $0x28] sm:$0xff] %v456_v50   ;;  %v201_v61 = vadd.f32 %v626_v16, %v200_v53  ;;  %v233_v62 = vadd.f32 %v626_v16, %v232_v54  ;;  %v212_v63 = vadd.f32 %v514_v59, %v626_v16  ;;  %v203_v1 = vpop.f32.mrb[7].mxu0  ;;  %v235_v2 = vpop.f32.mrb[7].mxu1 }
 0x102   :  { %v244_v0 = vadd.f32 %v522_v60, %v626_v16  ;;  %432 = vst [vmem:[%s675_s3] sm:$0xff] %v431_v55   ;;  %471 = vst [vmem:[%s675_s3 + $0x20] sm:$0xff] %v451_v56   ;;  %v269_v3 = vmul.f32 0.1, %v209_v57  ;;  %vm253_vm8 = vcmp.gt.f32.partialorder %v209_v57, 0.0  ;;  %v277_v4 = vmul.f32 0.1, %v241_v58 }
 0x103   :  { %vm261_vm9 = vcmp.gt.f32.partialorder %v241_v58, 0.0  ;;  %vm251_vm10 = vcmp.gt.f32.partialorder %v201_v61, 0.0  ;;  %vm254_vm11 = vcmp.gt.f32.partialorder %v212_v63, 0.0  ;;  %v270_v5 = vmul.f32 0.1, %v212_v63 }
 0x104   :  { %v267_v6 = vmul.f32 0.1, %v201_v61  ;;  %vm259_vm12 = vcmp.gt.f32.partialorder %v233_v62, 0.0  ;;  %vm262_vm13 = vcmp.gt.f32.partialorder %v244_v0, 0.0  ;;  %v278_v7 = vmul.f32 0.1, %v244_v0 }
 0x105   :  { %v285_v8 = vsel %vm253_vm8, %v209_v57, %v269_v3  ;;  %v286_v9 = vsel %vm254_vm11, %v212_v63, %v270_v5  ;;  %v204_v10 = vadd.f32 %v626_v16, %v203_v1  ;;  %v236_v11 = vadd.f32 %v626_v16, %v235_v2 }
 0x106   :  { %v293_v12 = vsel %vm261_vm9, %v241_v58, %v277_v4  ;;  %v275_v13 = vmul.f32 0.1, %v233_v62  ;;  %v446_v14 = vpack.c.bf16 %v286_v9, %v285_v8  ;;  %v294_v15 = vsel %vm262_vm13, %v244_v0, %v278_v7 }
 0x107   :  { %v466_v17 = vpack.c.bf16 %v294_v15, %v293_v12  ;;  %vm252_vm14 = vcmp.gt.f32.partialorder %v204_v10, 0.0  ;;  %v268_v18 = vmul.f32 0.1, %v204_v10  ;;  %vm260_vm15 = vcmp.gt.f32.partialorder %v236_v11, 0.0 }
 0x108   :  { %470 = vst [vmem:[%s675_s3 + $0x18] sm:$0xff] %v446_v14   ;;  %v276_v19 = vmul.f32 0.1, %v236_v11  ;;  %v283_v20 = vsel %vm251_vm10, %v201_v61, %v267_v6  ;;  %v291_v21 = vsel %vm259_vm12, %v233_v62, %v275_v13 }
 0x109   :  { %474 = vst [vmem:[%s675_s3 + $0x38] sm:$0xff] %v466_v17   ;;  %v284_v16 = vsel %vm252_vm14, %v204_v10, %v268_v18 }
 0x10a   :  { %v441_v22 = vpack.c.bf16 %v284_v16, %v283_v20  ;;  %v292_v23 = vsel %vm260_vm15, %v236_v11, %v276_v19 }
 0x10b   :  { %v461_v24 = vpack.c.bf16 %v292_v23, %v291_v21 }
 0x10c   :  { %469 = vst [vmem:[%s675_s3 + $0x10] sm:$0xff] %v441_v22  }
 0x10d   :  { %473 = vst [vmem:[%s675_s3 + $0x30] sm:$0xff] %v461_v24  }

// kernel: yolov3_upsample_prep_forward.13
= control target key start
LH: loop header
LB: loop body
LE: loop exit
PB: predicated region body
PF: predicated region fallthrough
CT: control target
= control target key end

     0   :  { %s602_s1 = inlined_call_operand.vmem [shape: bf16[128,128], index: 1, kind: input, shape index: {}]   ;;  %s603_s0 = inlined_call_operand.vmem [shape: bf16[128,128], index: 0, kind: input, shape index: {}]   ;;  %s604_s2 = inlined_call_operand.vmem [shape: f32[1,128], index: 2, kind: input, shape index: {}]   ;;  %s605_s3 = inlined_call_operand.vmem [shape: bf16[128,128], index: 3, kind: output, shape index: {}]  }
   0x1   :  { %v491_v0 = vld [vmem:[%s602_s1] sm:$0xff]   ;;  %v492_v1 = vld [vmem:[%s602_s1 + $0x8] sm:$0xff]   ;;  %v493_v2 = vld [vmem:[%s602_s1 + $0x10] sm:$0xff]  }
   0x2   :  { %443 = vmatprep.subr.bf16.mxu0 %v491_v0  ;;  %475 = vmatprep.subr.bf16.mxu1 %v491_v0  ;;  %v494_v3 = vld [vmem:[%s602_s1 + $0x18] sm:$0xff]   ;;  %v499_v4 = vld [vmem:[%s603_s0] sm:$0xff]   ;;  %v496_v7 = vld [vmem:[%s602_s1 + $0x28] sm:$0xff]  }
   0x3   :  { %444 = vmatpush3.bf16.msra.mxu0 %v491_v0  ;;  %483 = vmatpush3.bf16.msra.mxu1 %v491_v0  ;;  %v500_v5 = vld [vmem:[%s603_s0 + $0x20] sm:$0xff]   ;;  %v497_v8 = vld [vmem:[%s602_s1 + $0x30] sm:$0xff]   ;;  %v498_v9 = vld [vmem:[%s602_s1 + $0x38] sm:$0xff]  }
   0x4   :  { %445 = vmatprep.subr.bf16.mxu0 %v492_v1  ;;  %476 = vmatprep.subr.bf16.mxu1 %v492_v1  ;;  %v495_v6 = vld [vmem:[%s602_s1 + $0x20] sm:$0xff]   ;;  %v501_v10 = vld [vmem:[%s603_s0 + $0x8] sm:$0xff]   ;;  %v503_v12 = vld [vmem:[%s603_s0 + $0x10] sm:$0xff]  }
   0x5   :  { %459 = vmatprep.mubr.bf16.mxu0 %v499_v4  ;;  %467 = vmatprep.mubr.bf16.mxu1 %v500_v5  ;;  %v502_v11 = vld [vmem:[%s603_s0 + $0x28] sm:$0xff]   ;;  %v504_v13 = vld [vmem:[%s603_s0 + $0x30] sm:$0xff]   ;;  %v505_v14 = vld [vmem:[%s603_s0 + $0x18] sm:$0xff]  }
   0x6   :  { %v506_v15 = vld [vmem:[%s603_s0 + $0x38] sm:$0xff]   ;;  %v331_v17 = vld [vmem:[%s604_s2] ss:$0 sm:$0xff] }
   0x7   :  { %446 = vmatpush3.bf16.msra.mxu0 %v492_v1  ;;  %484 = vmatpush3.bf16.msra.mxu1 %v492_v1 }
   0x8   :  { %447 = vmatprep.subr.bf16.mxu0 %v493_v2  ;;  %477 = vmatprep.subr.bf16.mxu1 %v493_v2 }
   0xb   :  { %448 = vmatpush3.bf16.msra.mxu0 %v493_v2  ;;  %485 = vmatpush3.bf16.msra.mxu1 %v493_v2 }
   0xc   :  { %449 = vmatprep.subr.bf16.mxu0 %v494_v3  ;;  %478 = vmatprep.subr.bf16.mxu1 %v494_v3 }
   0xf   :  { %450 = vmatpush3.bf16.msra.mxu0 %v494_v3  ;;  %486 = vmatpush3.bf16.msra.mxu1 %v494_v3 }
  0x10   :  { %451 = vmatprep.subr.bf16.mxu0 %v495_v6  ;;  %479 = vmatprep.subr.bf16.mxu1 %v495_v6 }
  0x13   :  { %452 = vmatpush3.bf16.msra.mxu0 %v495_v6  ;;  %487 = vmatpush3.bf16.msra.mxu1 %v495_v6 }
  0x14   :  { %453 = vmatprep.subr.bf16.mxu0 %v496_v7  ;;  %480 = vmatprep.subr.bf16.mxu1 %v496_v7 }
  0x17   :  { %454 = vmatpush3.bf16.msra.mxu0 %v496_v7  ;;  %488 = vmatpush3.bf16.msra.mxu1 %v496_v7 }
  0x18   :  { %455 = vmatprep.subr.bf16.mxu0 %v497_v8  ;;  %481 = vmatprep.subr.bf16.mxu1 %v497_v8 }
  0x1b   :  { %456 = vmatpush3.bf16.msra.mxu0 %v497_v8  ;;  %489 = vmatpush3.bf16.msra.mxu1 %v497_v8 }
  0x1c   :  { %457 = vmatprep.subr.bf16.mxu0 %v498_v9  ;;  %482 = vmatprep.subr.bf16.mxu1 %v498_v9 }
  0x1f   :  { %458 = vmatpush3.bf16.msra.mxu0 %v498_v9  ;;  %490 = vmatpush3.bf16.msra.mxu1 %v498_v9 }
  0x22   :  { %460 = vmatmul.mubr.bf16.vlgmr.msra.gmra.mrb[0].mxu0 %v501_v10  ;;  %468 = vmatmul.mubr.bf16.vlgmr.msra.gmra.mrb[0].mxu1 %v502_v11 }
  0x23   :  { %463 = vmatprep.mubr.bf16.mxu0 %v503_v12  ;;  %471 = vmatprep.mubr.bf16.mxu1 %v504_v13 }
  0x2a   :  { %464 = vmatmul.mubr.bf16.gmra.mrb[4].mxu0 %v505_v14  ;;  %472 = vmatmul.mubr.bf16.gmra.mrb[4].mxu1 %v506_v15 }
  0xf5   :  { %v461_v16 = vpop.f32.mrb[0].mxu0  ;;  %v469_v18 = vpop.f32.mrb[0].mxu1 }
  0xf6   :  { %v184_v19 = vpop.f32.mrb[1].mxu0  ;;  %v216_v20 = vpop.f32.mrb[1].mxu1  ;;  %v193_v23 = vadd.f32 %v461_v16, %v331_v17  ;;  %v225_v24 = vadd.f32 %v469_v18, %v331_v17 }
  0xf7   :  { %v462_v21 = vpop.f32.mrb[2].mxu0  ;;  %v470_v22 = vpop.f32.mrb[2].mxu1  ;;  %v185_v29 = vadd.f32 %v331_v17, %v184_v19  ;;  %v217_v30 = vadd.f32 %v331_v17, %v216_v20 }
  0xf8   :  { %v196_v25 = vadd.f32 %v462_v21, %v331_v17  ;;  %v228_v26 = vadd.f32 %v470_v22, %v331_v17  ;;  %v187_v27 = vpop.f32.mrb[3].mxu0  ;;  %v219_v28 = vpop.f32.mrb[3].mxu1 }
  0xf9   :  { %v188_v31 = vadd.f32 %v331_v17, %v187_v27  ;;  %v220_v32 = vadd.f32 %v331_v17, %v219_v28 }
  0xfa   :  { %v388_v33 = vpack.c.bf16 %v196_v25, %v193_v23  ;;  %v408_v34 = vpack.c.bf16 %v228_v26, %v225_v24 }
  0xfb   :  { %v383_v35 = vpack.c.bf16 %v188_v31, %v185_v29  ;;  %v403_v36 = vpack.c.bf16 %v220_v32, %v217_v30 }
  0xfc   :  { %420 = vst [vmem:[%s605_s3 + $0x8] sm:$0xff] %v388_v33   ;;  %424 = vst [vmem:[%s605_s3 + $0x28] sm:$0xff] %v408_v34  }
  0xfd   :  { %384 = vst [vmem:[%s605_s3] sm:$0xff] %v383_v35   ;;  %423 = vst [vmem:[%s605_s3 + $0x20] sm:$0xff] %v403_v36   ;;  %v465_v37 = vpop.f32.mrb[4].mxu0  ;;  %v473_v38 = vpop.f32.mrb[4].mxu1 }
  0xfe   :  { %v200_v39 = vpop.f32.mrb[5].mxu0  ;;  %v232_v40 = vpop.f32.mrb[5].mxu1  ;;  %v209_v43 = vadd.f32 %v465_v37, %v331_v17  ;;  %v241_v44 = vadd.f32 %v473_v38, %v331_v17 }
  0xff   :  { %v466_v41 = vpop.f32.mrb[6].mxu0  ;;  %v474_v42 = vpop.f32.mrb[6].mxu1  ;;  %v201_v49 = vadd.f32 %v331_v17, %v200_v39  ;;  %v233_v50 = vadd.f32 %v331_v17, %v232_v40 }
 0x100   :  { %v212_v45 = vadd.f32 %v466_v41, %v331_v17  ;;  %v244_v46 = vadd.f32 %v474_v42, %v331_v17  ;;  %v203_v47 = vpop.f32.mrb[7].mxu0  ;;  %v235_v48 = vpop.f32.mrb[7].mxu1 }
 0x101   :  { %v204_v51 = vadd.f32 %v331_v17, %v203_v47  ;;  %v236_v52 = vadd.f32 %v331_v17, %v235_v48 }
 0x102   :  { %v398_v53 = vpack.c.bf16 %v212_v45, %v209_v43  ;;  %v418_v54 = vpack.c.bf16 %v244_v46, %v241_v44 }
 0x103   :  { %v393_v55 = vpack.c.bf16 %v204_v51, %v201_v49  ;;  %v413_v56 = vpack.c.bf16 %v236_v52, %v233_v50 }
 0x104   :  { %422 = vst [vmem:[%s605_s3 + $0x18] sm:$0xff] %v398_v53   ;;  %426 = vst [vmem:[%s605_s3 + $0x38] sm:$0xff] %v418_v54  }
 0x105   :  { %421 = vst [vmem:[%s605_s3 + $0x10] sm:$0xff] %v393_v55   ;;  %425 = vst [vmem:[%s605_s3 + $0x30] sm:$0xff] %v413_v56  }

</bundles_post_ra>
